<compile_context>
chip_gen: v7x
topology: tpu7x:2x2x1
jax: 0.10.0
libtpu: 0.0.40
codegen_flags: <defaults>
</compile_context>

<pallas_src>
import functools
import math

import jax
import jax.numpy as jnp
from jax.experimental import pallas as pl
from jax.experimental.pallas import tpu as pltpu

STRIDE = 2
EPS = 1e-5  # InstanceNorm2d default

# Sub-pixel decomposition of ConvTranspose2d(k=4, s=2, p=1).
# Output row oh = 2*i + a gets contributions from kernel row kh applied at padded input
# row i + dh (x is zero-padded by 1 at the top/left):
#   a == 0: (kh=1, dh=1), (kh=3, dh=0)        a == 1: (kh=0, dh=2), (kh=2, dh=1)
# and identically for columns.
_ROW_TAPS = {0: ((1, 1), (3, 0)), 1: ((0, 2), (2, 1))}
_COL_TAPS = _ROW_TAPS
_DH_TO_KH = {a: {dh: kh for kh, dh in taps} for a, taps in _ROW_TAPS.items()}


def _round_up(x, m):
    return (x + m - 1) // m * m


def _upsample_kernel(x_ref, w_ref, m_ref, o_ref, *, H, W, WP, fused, eps):
    # x_ref: (1, Ci_p, Lx)   bf16 zero-padded input, flattened with row pitch WP
    # w_ref: fused  -> (1, 4*TCO, 9*Ci_p)    bf16 phase/shift-stacked weights
    #        !fused -> (1, 4, 4, TCO, Ci_p)  bf16 per-(phase, tap) weight matrices
    # m_ref: (1, P)          f32, 1.0 on real output columns, 0.0 on pad columns
    # o_ref: (1, 4, TCO, P)  phase-separated, normalized + ReLU'd conv output
    TCO = o_ref.shape[2]
    P = o_ref.shape[3]
    inv_cnt = 1.0 / (4.0 * H * W)
    mask = m_ref[...]                                     # (1, P)

    def view(dh, dw):
        k = dh * WP + dw                                  # static lane offset
        return x_ref[0, :, k:k + P]                       # (Ci_p, P) bf16

    if fused:
        # 9 distinct shifted views stacked along the contraction axis -> one deep
        # matmul producing all 4 sub-pixel phases at once (MXU, f32 accumulate).
        rhs = jnp.concatenate(
            [view(dh, dw) for dh in range(3) for dw in range(3)], axis=0)
        y = jnp.dot(w_ref[0], rhs, preferred_element_type=jnp.float32)   # (4*TCO, P)

        ym = y * mask                       # pad columns excluded from the stats
        s1 = jnp.sum(ym, axis=1, keepdims=True)                          # (4*TCO, 1)
        s2 = jnp.sum(ym * y, axis=1, keepdims=True)
        ssum = s1[:TCO] + s1[TCO:2 * TCO] + s1[2 * TCO:3 * TCO] + s1[3 * TCO:]
        ssq = s2[:TCO] + s2[TCO:2 * TCO] + s2[2 * TCO:3 * TCO] + s2[3 * TCO:]
        mean = ssum * inv_cnt                                            # (TCO, 1)
        var = jnp.maximum(ssq * inv_cnt - mean * mean, 0.0)
        inv_std = jax.lax.rsqrt(var + eps)                               # EUP
        mean4 = jnp.concatenate([mean, mean, mean, mean], axis=0)        # (4*TCO, 1)
        inv4 = jnp.concatenate([inv_std, inv_std, inv_std, inv_std], axis=0)
        y_n = jnp.maximum((y - mean4) * inv4, 0.0)
        o_ref[0, :, :, :] = y_n.reshape(4, TCO, P).astype(o_ref.dtype)
    else:
        # Large-Ci path: K = Ci_p is already deep; the 9 de-duplicated shifted views
        # feed the 16 per-(phase, tap) dots.  Raw phase tiles are parked in the
        # VMEM-resident output block and normalized in place once stats are complete.
        views = {(dh, dw): view(dh, dw) for dh in range(3) for dw in range(3)}
        mask_b = jnp.broadcast_to(mask, (TCO, P))         # hoisted out of the loop
        ssum = jnp.zeros((TCO, 1), jnp.float32)
        ssq = jnp.zeros((TCO, 1), jnp.float32)
        for p in range(4):
            a, b = divmod(p, 2)
            y = jnp.zeros((TCO, P), jnp.float32)
            t = 0
            for _kh, dh in _ROW_TAPS[a]:
                for _kw, dw in _COL_TAPS[b]:
                    y = y + jnp.dot(w_ref[0, p, t], views[(dh, dw)],
                                    preferred_element_type=jnp.float32)
                    t += 1
            ym = y * mask_b
            ssum = ssum + jnp.sum(ym, axis=1, keepdims=True)
            ssq = ssq + jnp.sum(ym * y, axis=1, keepdims=True)
            o_ref[0, p, :, :] = y.astype(o_ref.dtype)
        mean = ssum * inv_cnt
        var = jnp.maximum(ssq * inv_cnt - mean * mean, 0.0)
        inv_std = jax.lax.rsqrt(var + eps)
        for p in range(4):
            yp = o_ref[0, p, :, :].astype(jnp.float32)
            o_ref[0, p, :, :] = jnp.maximum((yp - mean) * inv_std, 0.0).astype(o_ref.dtype)


def upsample_forward(x_nchw, skip_nchw, weight_t, eps=EPS, fuse_phases=None):
    """ConvTranspose2d(4,2,1,bias=False) -> InstanceNorm2d -> ReLU -> concat(skip).

    weight_t has PyTorch ConvTranspose2d layout (Ci, Co, 4, 4).
    """
    N, Ci, H, W = x_nchw.shape
    Co = weight_t.shape[1]
    OH, OW = STRIDE * H, STRIDE * W
    out_dtype = x_nchw.dtype

    # Channel padding to multiples of 16 so bf16 sublane tiles stay dense.
    Ci_p = _round_up(Ci, 16)
    Co_p = _round_up(Co, 16)
    # Co tiling (grid axis): bounds the output block (VMEM) and keeps both v7x
    # TensorCores busy even at N == 1.  InstanceNorm is per-channel -> exact split.
    n_ct = (Co_p + 127) // 128
    TCO = _round_up(-(-Co_p // n_ct), 16)
    Co_pp = TCO * n_ct

    # Fused single-matmul path while the stacked contraction is still shallow.
    fused = (4 * Ci_p < 256) if fuse_phases is None else bool(fuse_phases)

    # Row pitch: >= W + 2 zero columns, chosen so P = H * WP (flattened spatial extent
    # of one phase) is a multiple of 128 -> unmasked, full-lane output stores.
    step = 128 // math.gcd(H, 128)
    WP = _round_up(W + 2, step)
    P = H * WP

    # Zero-padded bf16 input flattened to (N, Ci_p, Lx); image at rows [1, H+1),
    # cols [1, W+1).  ~0.5x of x in HBM (bf16) — no im2col, no zero-dilated buffer.
    HP = H + 3
    Lx = _round_up(HP * WP, 128)
    x_pad = jnp.zeros((N, Ci_p, HP, WP), jnp.bfloat16)
    x_pad = x_pad.at[:, :Ci, 1:H + 1, 1:W + 1].set(x_nchw.astype(jnp.bfloat16))
    x_flat = x_pad.reshape(N, Ci_p, HP * WP)
    if Lx != HP * WP:
        x_flat = jnp.pad(x_flat, ((0, 0), (0, 0), (0, Lx - HP * WP)))

    # One-time weight re-layout (fused by XLA under jit), cast to bf16.
    if fused:
        wb = jnp.zeros((4, Co_pp, 9, Ci_p), jnp.float32)
        for p in range(4):
            a, b = divmod(p, 2)
            for dh, kh in _DH_TO_KH[a].items():
                for dw, kw in _DH_TO_KH[b].items():
                    wb = wb.at[p, :Co, dh * 3 + dw, :Ci].set(
                        jnp.transpose(weight_t[:, :, kh, kw]))
        wb = wb.reshape(4, n_ct, TCO, 9 * Ci_p)
        w_arr = jnp.transpose(wb, (1, 0, 2, 3)).reshape(
            n_ct, 4 * TCO, 9 * Ci_p).astype(jnp.bfloat16)
        w_spec = pl.BlockSpec((1, 4 * TCO, 9 * Ci_p), lambda n, ct: (ct, 0, 0))
    else:
        taps = []
        for p in range(4):
            a, b = divmod(p, 2)
            ph = [jnp.transpose(weight_t[:, :, kh, kw])              # (Co, Ci)
                  for kh, _dh in _ROW_TAPS[a] for kw, _dw in _COL_TAPS[b]]
            taps.append(jnp.stack(ph, axis=0))
        wt4 = jnp.stack(taps, axis=0)                                # (4, 4, Co, Ci)
        wt4 = jnp.pad(wt4, ((0, 0), (0, 0), (0, Co_pp - Co), (0, Ci_p - Ci)))
        wt4 = wt4.reshape(4, 4, n_ct, TCO, Ci_p)
        w_arr = jnp.transpose(wt4, (2, 0, 1, 3, 4)).astype(jnp.bfloat16)
        w_spec = pl.BlockSpec((1, 4, 4, TCO, Ci_p), lambda n, ct: (ct, 0, 0, 0, 0))

    # Valid-column mask (pad columns are excluded from the InstanceNorm stats).
    col = jnp.arange(P, dtype=jnp.int32) % WP
    mask = (col < W).astype(jnp.float32).reshape(1, P)

    # Scoped-VMEM budget: double-buffered blocks + in-kernel working set + headroom.
    ob = jnp.dtype(out_dtype).itemsize
    x_blk = Ci_p * Lx * 2
    o_blk = 4 * TCO * P * ob
    w_blk = (4 * TCO * 9 * Ci_p * 2) if fused else (16 * TCO * Ci_p * 2)
    work = 9 * Ci_p * P * 2 + 8 * TCO * P * 4
    est = 2 * (x_blk + o_blk + w_blk + P * 4) + work
    vmem_limit = int(min(112 << 20, max(32 << 20, est + est // 4 + (4 << 20))))

    y_ph = pl.pallas_call(
        functools.partial(_upsample_kernel, H=H, W=W, WP=WP, fused=fused, eps=eps),
        out_shape=jax.ShapeDtypeStruct((N, 4, Co_pp, P), out_dtype),
        grid=(N, n_ct),
        in_specs=[
            pl.BlockSpec((1, Ci_p, Lx), lambda n, ct: (n, 0, 0)),  # resident across ct
            w_spec,
            pl.BlockSpec((1, P), lambda n, ct: (0, 0)),
        ],
        out_specs=pl.BlockSpec((1, 4, TCO, P), lambda n, ct: (n, 0, ct, 0)),
        compiler_params=pltpu.CompilerParams(
            dimension_semantics=("parallel", "parallel"),
            vmem_limit_bytes=vmem_limit),
    )(x_flat, w_arr, mask)

    # Pixel-shuffle the 4 phases back to NCHW, drop channel / column padding, and
    # concat the skip connection (pure data movement, fused by XLA under jit).
    y = y_ph[:, :, :Co, :].reshape(N, 2, 2, Co, H, WP)[..., :W]    # (N, a, b, Co, i, j)
    y = jnp.transpose(y, (0, 3, 4, 1, 5, 2)).reshape(N, Co, OH, OW)
    return jnp.concatenate([y, skip_nchw.astype(y.dtype)], axis=1)


def _reference(x, skip, wt, operand_dtype=jnp.float32):
    """Pure-JAX reference mirroring the PyTorch module (conv operands in operand_dtype)."""
    w_conv = jnp.transpose(jnp.flip(wt, axis=(2, 3)), (1, 0, 2, 3))    # (Co, Ci, 4, 4)
    y = jax.lax.conv_general_dilated(
        x.astype(operand_dtype), w_conv.astype(operand_dtype),
        window_strides=(1, 1), padding=((2, 2), (2, 2)),
        lhs_dilation=(STRIDE, STRIDE),
        dimension_numbers=("NCHW", "OIHW", "NCHW"),
        preferred_element_type=jnp.float32)
    mean = jnp.mean(y, axis=(2, 3), keepdims=True)
    var = jnp.mean((y - mean) ** 2, axis=(2, 3), keepdims=True)
    y = jnp.maximum((y - mean) * jax.lax.rsqrt(var + EPS), 0.0)
    return jnp.concatenate([y.astype(x.dtype), skip], axis=1)


if __name__ == "__main__":
    N, Ci, Co, H, W = 2, 4, 4, 16, 16
    key = jax.random.PRNGKey(0)
    kx, ks, kw = jax.random.split(key, 3)

    x = jax.random.normal(kx, (N, Ci, H, W), dtype=jnp.float32)
    skip = jax.random.normal(ks, (N, Co, STRIDE * H, STRIDE * W), dtype=jnp.float32)
    # deterministic ConvTranspose2d weight, PyTorch layout (Ci, Co, KH, KW)
    weight_t = 0.1 * jax.random.normal(kw, (Ci, Co, 4, 4), dtype=jnp.float32)

    ref_bf16 = jax.block_until_ready(_reference(x, skip, weight_t, jnp.bfloat16))
    ref_f32 = jax.block_until_ready(_reference(x, skip, weight_t, jnp.float32))
    expect_shape = (N, Co + skip.shape[1], STRIDE * H, STRIDE * W)

    # Exercise both kernel paths: fused single-matmul (auto for small Ci) and per-tap.
    for fuse in (None, False):
        fwd = jax.jit(functools.partial(upsample_forward, fuse_phases=fuse))
        out = jax.block_until_ready(fwd(x, skip, weight_t))
        assert out.shape == expect_shape, (fuse, out.shape)
        err = float(jnp.max(jnp.abs(out - ref_bf16)))
        assert jnp.allclose(out, ref_bf16, atol=5e-3, rtol=5e-3), (fuse, err)
        err32 = float(jnp.max(jnp.abs(out - ref_f32)))
        assert jnp.allclose(out, ref_f32, atol=1e-1, rtol=1e-1), (fuse, err32)

    print("KERNEL_OK")
</pallas_src>

<mosaic_0001>
module attributes {stable_mosaic.version = 11 : i64} {
  func.func @_upsample_kernel(%arg0: i32, %arg1: i32, %arg2: memref<1x16x512xbf16, #tpu.memory_space<vmem>>, %arg3: memref<1x64x144xbf16, #tpu.memory_space<vmem>>, %arg4: memref<1x384xf32, #tpu.memory_space<vmem>>, %arg5: memref<1x4x16x384xf32, #tpu.memory_space<vmem>>) attributes {dimension_semantics = [#tpu.dimension_semantics<parallel>, #tpu.dimension_semantics<parallel>], iteration_bounds = array<i64: 2, 1>, scalar_prefetch = 0 : i64, scratch_operands = 0 : i64, tpu.core_type = #tpu.core_type<tc>, window_params = [{transform_indices = @transform_0, window_bounds = array<i64: 1, 16, 512>}, {transform_indices = @transform_1, window_bounds = array<i64: 1, 64, 144>}, {pipeline_mode = #tpu.pipeline_mode<synchronous>, transform_indices = @transform_2, window_bounds = array<i64: 1, 384>}, {transform_indices = @transform_3, window_bounds = array<i64: 1, 4, 16, 384>}]} {
    %c0 = arith.constant 0 : index
    %c0_0 = arith.constant 0 : index
    %0 = vector.load %arg4[%c0, %c0_0] : memref<1x384xf32, #tpu.memory_space<vmem>>, vector<1x384xf32>
    %c0_1 = arith.constant 0 : index
    %c0_2 = arith.constant 0 : index
    %c0_3 = arith.constant 0 : index
    %1 = vector.load %arg2[%c0_1, %c0_2, %c0_3] : memref<1x16x512xbf16, #tpu.memory_space<vmem>>, vector<1x16x384xbf16>
    %2 = vector.shape_cast %1 : vector<1x16x384xbf16> to vector<16x384xbf16>
    %c0_4 = arith.constant 0 : index
    %c0_5 = arith.constant 0 : index
    %c1 = arith.constant 1 : index
    %3 = vector.load %arg2[%c0_4, %c0_5, %c1] : memref<1x16x512xbf16, #tpu.memory_space<vmem>>, vector<1x16x384xbf16>
    %4 = vector.shape_cast %3 : vector<1x16x384xbf16> to vector<16x384xbf16>
    %c0_6 = arith.constant 0 : index
    %c0_7 = arith.constant 0 : index
    %c2 = arith.constant 2 : index
    %5 = vector.load %arg2[%c0_6, %c0_7, %c2] : memref<1x16x512xbf16, #tpu.memory_space<vmem>>, vector<1x16x384xbf16>
    %6 = vector.shape_cast %5 : vector<1x16x384xbf16> to vector<16x384xbf16>
    %c0_8 = arith.constant 0 : index
    %c0_9 = arith.constant 0 : index
    %c24 = arith.constant 24 : index
    %7 = vector.load %arg2[%c0_8, %c0_9, %c24] : memref<1x16x512xbf16, #tpu.memory_space<vmem>>, vector<1x16x384xbf16>
    %8 = vector.shape_cast %7 : vector<1x16x384xbf16> to vector<16x384xbf16>
    %c0_10 = arith.constant 0 : index
    %c0_11 = arith.constant 0 : index
    %c25 = arith.constant 25 : index
    %9 = vector.load %arg2[%c0_10, %c0_11, %c25] : memref<1x16x512xbf16, #tpu.memory_space<vmem>>, vector<1x16x384xbf16>
    %10 = vector.shape_cast %9 : vector<1x16x384xbf16> to vector<16x384xbf16>
    %c0_12 = arith.constant 0 : index
    %c0_13 = arith.constant 0 : index
    %c26 = arith.constant 26 : index
    %11 = vector.load %arg2[%c0_12, %c0_13, %c26] : memref<1x16x512xbf16, #tpu.memory_space<vmem>>, vector<1x16x384xbf16>
    %12 = vector.shape_cast %11 : vector<1x16x384xbf16> to vector<16x384xbf16>
    %c0_14 = arith.constant 0 : index
    %c0_15 = arith.constant 0 : index
    %c48 = arith.constant 48 : index
    %13 = vector.load %arg2[%c0_14, %c0_15, %c48] : memref<1x16x512xbf16, #tpu.memory_space<vmem>>, vector<1x16x384xbf16>
    %14 = vector.shape_cast %13 : vector<1x16x384xbf16> to vector<16x384xbf16>
    %c0_16 = arith.constant 0 : index
    %c0_17 = arith.constant 0 : index
    %c49 = arith.constant 49 : index
    %15 = vector.load %arg2[%c0_16, %c0_17, %c49] : memref<1x16x512xbf16, #tpu.memory_space<vmem>>, vector<1x16x384xbf16>
    %16 = vector.shape_cast %15 : vector<1x16x384xbf16> to vector<16x384xbf16>
    %c0_18 = arith.constant 0 : index
    %c0_19 = arith.constant 0 : index
    %c50 = arith.constant 50 : index
    %17 = vector.load %arg2[%c0_18, %c0_19, %c50] : memref<1x16x512xbf16, #tpu.memory_space<vmem>>, vector<1x16x384xbf16>
    %18 = vector.shape_cast %17 : vector<1x16x384xbf16> to vector<16x384xbf16>
    %19 = tpu.concatenate %2, %4, %6, %8, %10, %12, %14, %16, %18 in 0 : vector<16x384xbf16>, vector<16x384xbf16>, vector<16x384xbf16>, vector<16x384xbf16>, vector<16x384xbf16>, vector<16x384xbf16>, vector<16x384xbf16>, vector<16x384xbf16>, vector<16x384xbf16> -> vector<144x384xbf16>
    %c0_20 = arith.constant 0 : index
    %c0_21 = arith.constant 0 : index
    %c0_22 = arith.constant 0 : index
    %20 = vector.load %arg3[%c0_20, %c0_21, %c0_22] : memref<1x64x144xbf16, #tpu.memory_space<vmem>>, vector<1x64x144xbf16>
    %21 = vector.shape_cast %20 : vector<1x64x144xbf16> to vector<64x144xbf16>
    %cst = arith.constant dense<0.000000e+00> : vector<64x384xf32>
    %22 = tpu.matmul %21, %19, %cst {dimension_numbers = #tpu.dot_dimension_numbers<[1], [0], [0], [1], [0, 0, 1, 1], [], []>} : vector<64x144xbf16>, vector<144x384xbf16>, vector<64x384xf32> -> vector<64x384xf32>
    %23 = vector.broadcast %0 : vector<1x384xf32> to vector<64x384xf32>
    %24 = arith.mulf %22, %23 : vector<64x384xf32>
    %cst_23 = arith.constant dense<0.000000e+00> : vector<64xf32>
    %25 = vector.multi_reduction <add>, %24, %cst_23 [1] : vector<64x384xf32> to vector<64xf32>
    %26 = vector.shape_cast %25 : vector<64xf32> to vector<64x1xf32>
    %27 = arith.mulf %24, %22 : vector<64x384xf32>
    %cst_24 = arith.constant dense<0.000000e+00> : vector<64xf32>
    %28 = vector.multi_reduction <add>, %27, %cst_24 [1] : vector<64x384xf32> to vector<64xf32>
    %29 = vector.shape_cast %28 : vector<64xf32> to vector<64x1xf32>
    %30 = vector.extract_strided_slice %26 {offsets = [0, 0], sizes = [16, 1], strides = [1, 1]} : vector<64x1xf32> to vector<16x1xf32>
    %31 = vector.extract_strided_slice %26 {offsets = [16, 0], sizes = [16, 1], strides = [1, 1]} : vector<64x1xf32> to vector<16x1xf32>
    %32 = arith.addf %30, %31 : vector<16x1xf32>
    %33 = vector.extract_strided_slice %26 {offsets = [32, 0], sizes = [16, 1], strides = [1, 1]} : vector<64x1xf32> to vector<16x1xf32>
    %34 = arith.addf %32, %33 : vector<16x1xf32>
    %35 = vector.extract_strided_slice %26 {offsets = [48, 0], sizes = [16, 1], strides = [1, 1]} : vector<64x1xf32> to vector<16x1xf32>
    %36 = arith.addf %34, %35 : vector<16x1xf32>
    %37 = vector.extract_strided_slice %29 {offsets = [0, 0], sizes = [16, 1], strides = [1, 1]} : vector<64x1xf32> to vector<16x1xf32>
    %38 = vector.extract_strided_slice %29 {offsets = [16, 0], sizes = [16, 1], strides = [1, 1]} : vector<64x1xf32> to vector<16x1xf32>
    %39 = arith.addf %37, %38 : vector<16x1xf32>
    %40 = vector.extract_strided_slice %29 {offsets = [32, 0], sizes = [16, 1], strides = [1, 1]} : vector<64x1xf32> to vector<16x1xf32>
    %41 = arith.addf %39, %40 : vector<16x1xf32>
    %42 = vector.extract_strided_slice %29 {offsets = [48, 0], sizes = [16, 1], strides = [1, 1]} : vector<64x1xf32> to vector<16x1xf32>
    %43 = arith.addf %41, %42 : vector<16x1xf32>
    %cst_25 = arith.constant 9.765625E-4 : f32
    %44 = vector.broadcast %cst_25 : f32 to vector<16x1xf32>
    %45 = arith.mulf %36, %44 : vector<16x1xf32>
    %cst_26 = arith.constant 9.765625E-4 : f32
    %46 = vector.broadcast %cst_26 : f32 to vector<16x1xf32>
    %47 = arith.mulf %43, %46 : vector<16x1xf32>
    %48 = arith.mulf %45, %45 : vector<16x1xf32>
    %49 = arith.subf %47, %48 : vector<16x1xf32>
    %cst_27 = arith.constant 0.000000e+00 : f32
    %50 = vector.broadcast %cst_27 : f32 to vector<16x1xf32>
    %51 = arith.maximumf %49, %50 : vector<16x1xf32>
    %cst_28 = arith.constant 9.99999974E-6 : f32
    %52 = vector.broadcast %cst_28 : f32 to vector<16x1xf32>
    %53 = arith.addf %51, %52 : vector<16x1xf32>
    %54 = math.rsqrt %53 : vector<16x1xf32>
    %55 = tpu.concatenate %45, %45, %45, %45 in 0 : vector<16x1xf32>, vector<16x1xf32>, vector<16x1xf32>, vector<16x1xf32> -> vector<64x1xf32>
    %56 = tpu.concatenate %54, %54, %54, %54 in 0 : vector<16x1xf32>, vector<16x1xf32>, vector<16x1xf32>, vector<16x1xf32> -> vector<64x1xf32>
    %57 = vector.broadcast %55 : vector<64x1xf32> to vector<64x384xf32>
    %58 = arith.subf %22, %57 : vector<64x384xf32>
    %59 = vector.broadcast %56 : vector<64x1xf32> to vector<64x384xf32>
    %60 = arith.mulf %58, %59 : vector<64x384xf32>
    %cst_29 = arith.constant 0.000000e+00 : f32
    %61 = vector.broadcast %cst_29 : f32 to vector<64x384xf32>
    %62 = arith.maximumf %60, %61 : vector<64x384xf32>
    %63 = vector.shape_cast %62 : vector<64x384xf32> to vector<4x16x384xf32>
    %c0_30 = arith.constant 0 : index
    %c0_31 = arith.constant 0 : index
    %c0_32 = arith.constant 0 : index
    %c0_33 = arith.constant 0 : index
    %64 = vector.load %arg5[%c0_30, %c0_31, %c0_32, %c0_33] : memref<1x4x16x384xf32, #tpu.memory_space<vmem>>, vector<1x4x16x384xf32>
    %65 = vector.shape_cast %64 : vector<1x4x16x384xf32> to vector<4x16x384xf32>
    %66 = vector.shape_cast %63 : vector<4x16x384xf32> to vector<1x4x16x384xf32>
    tpu.vector_store %arg5[%c0_30, %c0_31, %c0_32, %c0_33], %66 {strides = array<i32>} : memref<1x4x16x384xf32, #tpu.memory_space<vmem>>, vector<1x4x16x384xf32>,
    return
  }
  func.func @transform_0(%arg0: i32, %arg1: i32) -> (i32, i32, i32) {
    %c0_i32 = arith.constant 0 : i32
    %c0_i32_0 = arith.constant 0 : i32
    %c0_i32_1 = arith.constant 0 : i32
    return %arg0, %c0_i32, %c0_i32_0 : i32, i32, i32
  }
  func.func @transform_1(%arg0: i32, %arg1: i32) -> (i32, i32, i32) {
    %c0_i32 = arith.constant 0 : i32
    %c0_i32_0 = arith.constant 0 : i32
    %c0_i32_1 = arith.constant 0 : i32
    return %arg1, %c0_i32, %c0_i32_0 : i32, i32, i32
  }
  func.func @transform_2(%arg0: i32, %arg1: i32) -> (i32, i32) {
    %c0_i32 = arith.constant 0 : i32
    %c0_i32_0 = arith.constant 0 : i32
    %c0_i32_1 = arith.constant 0 : i32
    return %c0_i32, %c0_i32_0 : i32, i32
  }
  func.func @transform_3(%arg0: i32, %arg1: i32) -> (i32, i32, i32, i32) {
    %c0_i32 = arith.constant 0 : i32
    %c0_i32_0 = arith.constant 0 : i32
    %c0_i32_1 = arith.constant 0 : i32
    return %arg0, %c0_i32, %arg1, %c0_i32_0 : i32, i32, i32, i32
  }
}

</mosaic_0001>

<bundles_post_ra>
// kernel: upsample_forward.1
= control target key start
LH: loop header
LB: loop body
LE: loop exit
PB: predicated region body
PF: predicated region fallthrough
CT: control target
= control target key end

     0   :  { %s1092_s12 = smov 0   ;;  %s1094_s13 = smov 0   ;;  %s1365_s0 = inlined_call_operand.vmem [shape: bf16[2,16,512], index: 0, kind: input, shape index: {}]   ;;  %s1366_s1 = inlined_call_operand.vmem [shape: bf16[1,64,144], index: 1, kind: input, shape index: {}]   ;;  %s1367_s2 = inlined_call_operand.vmem [shape: f32[1,384], index: 2, kind: input, shape index: {}]   ;;  %s1368_s3 = inlined_call_operand.vmem [shape: f32[2,4,16,384], index: 3, kind: output, shape index: {}]  }
   0x1   :  { %s1096_s14 = smov 0  }
   0x2 LB: > { %s25_s15 = sadd.s32 1, %s1057_s13  ;;  %p950_p0 = scmp.ge.s32.totalorder %s1061_s14, 1  ;;  %s1061_s14 = sphi %s1096_s14, %s13_s14   ;;  %s1057_s13 = sphi %s1094_s13, %s1370_s13   ;;  %s1053_s12 = sphi %s1092_s12, %s1369_s12  }
   0x3   : > { %p27_p1 = scmp.ge.s32.totalorder %s25_s15, 2  ;;  %p161_p2 = scmp.lt.s32.totalorder %s1061_s14, 3 }
   0x5   : > { %s1372_s15 = smov (%p27_p1, %s25_s15), 0  ;;  %p162_p3 = pnand %p950_p0, %p161_p2 }
   0x6   : > { %p195_p4 = scmp.lt.s32.totalorder (!%p162_p3), %s1053_s12, 1  ;;  %v1063_v0 = vmov (!%p162_p3), 0   ;;  %s1064_s20 = smov (!%p162_p3), 127   ;;  %v1025_v6 = vld [vmem:[%s1366_s1 + $0x4] ss:$8 sps:$4 sm:$0xff] (!%p162_p3)   ;;  %vm422_vm0 = vcmask (!%p162_p3), 130048  }
   0x7   : > { %165 = sbr.rel (%p162_p3) target bundleno = 752 (0x2f0), region = 32  ;;  %508 = vmatprep.subr.bf16.mxu1 (!%p162_p3), %v1063_v0  ;;  %1014 = vset.pattern.permute.xlu1 (!%p162_p3), %v1063_v0  ;;  %s1065_s21 = smov (!%p162_p3), 126   ;;  %vm266_vm1 = vcmask (!%p162_p3), 1039360   ;;  %vm281_vm2 = vcmask (!%p162_p3), 1031168   ;;  %vm296_vm3 = vcmask (!%p162_p3), 850944   ;;  %vm311_vm4 = vcmask (!%p162_p3), 842752  }
   0x8   : > { %1015 = vset.pattern.permute.xlu0 (!%p162_p3), %v1063_v0  ;;  %s1066_s22 = smov (!%p162_p3), 104   ;;  %s1067_s23 = smov (!%p162_p3), 103   ;;  %969 = vmatprep.mubr.msk.bf16.mxu0 (!%p162_p3), %vm422_vm0, %v1025_v6  ;;  %vm326_vm5 = vcmask (!%p162_p3), 834560   ;;  %vm341_vm6 = vcmask (!%p162_p3), 654336   ;;  %vm356_vm7 = vcmask (!%p162_p3), 646144   ;;  %vm371_vm8 = vcmask (!%p162_p3), 637952  }
   0x9   : > { %s1068_s24 = smov (!%p162_p3), 102   ;;  %s1069_s25 = smov (!%p162_p3), 80   ;;  %973 = vmatprep.mubr.msk.bf16.mxu1 (!%p162_p3), %vm422_vm0, %v1025_v6  ;;  %v1023_v62 = vld [vmem:[%s1366_s1] ss:$8 sps:$4 sm:$0xff] (!%p162_p3)   ;;  %v574_v6 = vlaneseq (!%p162_p3) }
   0xa   : > { %s1070_s26 = smov (!%p162_p3), 79   ;;  %s1071_s29 = smov (!%p162_p3), 78  }
   0xe   : > { %s1374_s12 = smov (!%p195_p4, %s1053_s12), 1 }
   0xf   : > { %s979_s16 = sshll.u32 %s1374_s12, 5 }
  0x10   : > { %s199_s19 = scalar_lea.vmem %s1365_s0, %s979_s16 }
  0x11   : > { %v1016_v1 = vld [vmem:[%s199_s19 + $0x4] ss:$16 sps:$4 sm:$0xff]   ;;  %v1018_v2 = vld [vmem:[%s199_s19] ss:$16 sps:$4 sm:$0xff]   ;;  %v1019_v3 = vld [vmem:[%s199_s19 + $0x8] ss:$16 sps:$4 sm:$0xff]  }
  0x12   : > { %260 = vrot.lane.b32.xlu0 %v1016_v1, %s1064_s20  ;;  %435 = vmatprep.subr.bf16.mxu0 %v1016_v1  ;;  %v1021_v4 = vld [vmem:[%s199_s19 + $0xc] ss:$16 sps:$4 sm:$0xff]   ;;  %v1022_v5 = vld [vmem:[%s199_s19 + $0x8] ss:$16 sps:$4 sm:$0xff]  }
  0x13   : > { %258 = vrot.lane.b32.xlu1 %v1018_v2, %s1064_s20  ;;  %436 = vmatpush1.bf16.msra.mxu0 %v1018_v2 }
  0x14   : > { %509 = vmatpush1.bf16.msra.mxu1 %v1022_v5  ;;  %v1034_v5 = vld [vmem:[%s1366_s1 + $0x30] ss:$8 sps:$4 sm:$0xff]  }
  0x15   : > { %510 = vmatprep.subr.bf16.mxu1 %v1063_v0 }
  0x16   : > { %262 = vrot.lane.b32.xlu0 %v1019_v3, %s1064_s20 }
  0x17   : > { %264 = vrot.lane.b32.xlu1 %v1021_v4, %s1064_s20 }
  0x1a   : > { %275 = vrot.lane.b32.xlu0 %v1016_v1, %s1065_s21 }
  0x1b   : > { %277 = vrot.lane.b32.xlu1 %v1019_v3, %s1065_s21 }
  0x1e   : > { %273 = vrot.lane.b32.xlu0 %v1018_v2, %s1065_s21 }
  0x1f   : > { %279 = vrot.lane.b32.xlu1 %v1021_v4, %s1065_s21 }
  0x22   : > { %290 = vrot.lane.b32.xlu0 %v1016_v1, %s1066_s22 }
  0x23   : > { %292 = vrot.lane.b32.xlu1 %v1019_v3, %s1066_s22 }
  0x26   : > { %288 = vrot.lane.b32.xlu0 %v1018_v2, %s1066_s22 }
  0x27   : > { %294 = vrot.lane.b32.xlu1 %v1021_v4, %s1066_s22 }
  0x2a   : > { %305 = vrot.lane.b32.xlu0 %v1016_v1, %s1067_s23 }
  0x2b   : > { %307 = vrot.lane.b32.xlu1 %v1019_v3, %s1067_s23 }
  0x2e   : > { %303 = vrot.lane.b32.xlu0 %v1018_v2, %s1067_s23 }
  0x2f   : > { %309 = vrot.lane.b32.xlu1 %v1021_v4, %s1067_s23  ;;  %s980_s23 = smul.u32 192, %s1374_s12 }
  0x32   : > { %320 = vrot.lane.b32.xlu0 %v1016_v1, %s1068_s24 }
  0x33   : > { %322 = vrot.lane.b32.xlu1 %v1019_v3, %s1068_s24 }
  0x36   : > { %318 = vrot.lane.b32.xlu0 %v1018_v2, %s1068_s24 }
  0x37   : > { %324 = vrot.lane.b32.xlu1 %v1021_v4, %s1068_s24 }
  0x3a   : > { %335 = vrot.lane.b32.xlu0 %v1016_v1, %s1069_s25 }
  0x3b   : > { %337 = vrot.lane.b32.xlu1 %v1019_v3, %s1069_s25 }
  0x3e   : > { %333 = vrot.lane.b32.xlu0 %v1018_v2, %s1069_s25 }
  0x3f   : > { %339 = vrot.lane.b32.xlu1 %v1021_v4, %s1069_s25  ;;  %s1330_s25 = scalar_lea.vmem %s1368_s3, %s980_s23 }
  0x42   : > { %350 = vrot.lane.b32.xlu0 %v1016_v1, %s1070_s26 }
  0x43   : > { %352 = vrot.lane.b32.xlu1 %v1019_v3, %s1070_s26 }
  0x46   : > { %348 = vrot.lane.b32.xlu0 %v1018_v2, %s1070_s26 }
  0x47   : > { %354 = vrot.lane.b32.xlu1 %v1021_v4, %s1070_s26 }
  0x4a   : > { %365 = vrot.lane.b32.xlu0 %v1016_v1, %s1071_s29  ;;  %v1026_v1 = vld [vmem:[%s1366_s1 + $0x14] ss:$8 sps:$4 sm:$0xff]  }
  0x4b   : > { %367 = vrot.lane.b32.xlu1 %v1019_v3, %s1071_s29  ;;  %v1031_v3 = vld [vmem:[%s1366_s1 + $0x20] ss:$8 sps:$4 sm:$0xff]  }
  0x4e   : > { %363 = vrot.lane.b32.xlu0 %v1018_v2, %s1071_s29  ;;  %v1029_v2 = vld [vmem:[%s1366_s1 + $0x24] ss:$8 sps:$4 sm:$0xff]  }
  0x4f   : > { %369 = vrot.lane.b32.xlu1 %v1021_v4, %s1071_s29  ;;  %v1032_v4 = vld [vmem:[%s1366_s1 + $0x34] ss:$8 sps:$4 sm:$0xff]  }
  0x84   : > { %v261_v7 = vpop.permute.xlu0 %260 }
  0x85   : > { %v259_v8 = vpop.permute.xlu1 %258 }
  0x86   : > { %v267_v13 = vsel %vm266_vm1, %v259_v8, %v261_v7 }
  0x88   : > { %v263_v9 = vpop.permute.xlu0 %262 }
  0x89   : > { %v265_v10 = vpop.permute.xlu1 %264  ;;  %v268_v11 = vsel %vm266_vm1, %v261_v7, %v263_v9  ;;  %v575_v7 = vshrl.u32 %v574_v6, 7 }
  0x8a   : > { %437 = vmatprep.subr.bf16.mxu0 %v268_v11  ;;  %v269_v12 = vsel %vm266_vm1, %v263_v9, %v265_v10  ;;  %v217_v9 = vld [vmem:[%s1367_s2] sm:$0x7] }
  0x8b   : > { %511 = vmatpush1.bf16.msra.mxu1 %v269_v12  ;;  %438 = vmatpush1.bf16.msra.mxu0 %v267_v13  ;;  %v576_v8 = vsub.s32 0, %v575_v7  ;;  %v580_v10 = vsub.s32 1, %v575_v7  ;;  %v584_v11 = vsub.s32 2, %v575_v7 }
  0x8c   : > { %v276_v14 = vpop.permute.xlu0 %275  ;;  %512 = vmatprep.subr.bf16.mxu1 %v1063_v0 }
  0x8d   : > { %v278_v15 = vpop.permute.xlu1 %277  ;;  %v1162_v12 = vrot.slane %v217_v9, %v576_v8  ;;  %v1164_v13 = vrot.slane %v217_v9, %v580_v10 }
  0x8e   : > { %v283_v16 = vsel %vm281_vm2, %v276_v14, %v278_v15 }
  0x8f   : > { %439 = vmatprep.subr.bf16.mxu0 %v283_v16 }
  0x90   : > { %v274_v17 = vpop.permute.xlu0 %273 }
  0x91   : > { %v280_v18 = vpop.permute.xlu1 %279  ;;  %v282_v19 = vsel %vm281_vm2, %v274_v17, %v276_v14  ;;  %v1166_v14 = vrot.slane %v217_v9, %v584_v11 }
  0x92   : > { %440 = vmatpush1.bf16.msra.mxu0 %v282_v19  ;;  %v284_v20 = vsel %vm281_vm2, %v278_v15, %v280_v18 }
  0x93   : > { %513 = vmatpush1.bf16.msra.mxu1 %v284_v20 }
  0x94   : > { %v291_v21 = vpop.permute.xlu0 %290  ;;  %514 = vmatprep.subr.bf16.mxu1 %v1063_v0 }
  0x95   : > { %v293_v22 = vpop.permute.xlu1 %292 }
  0x96   : > { %v298_v23 = vsel %vm296_vm3, %v291_v21, %v293_v22 }
  0x97   : > { %441 = vmatprep.subr.bf16.mxu0 %v298_v23 }
  0x98   : > { %v289_v24 = vpop.permute.xlu0 %288 }
  0x99   : > { %v295_v25 = vpop.permute.xlu1 %294  ;;  %v297_v26 = vsel %vm296_vm3, %v289_v24, %v291_v21 }
  0x9a   : > { %442 = vmatpush1.bf16.msra.mxu0 %v297_v26  ;;  %v299_v27 = vsel %vm296_vm3, %v293_v22, %v295_v25 }
  0x9b   : > { %515 = vmatpush1.bf16.msra.mxu1 %v299_v27 }
  0x9c   : > { %v306_v28 = vpop.permute.xlu0 %305  ;;  %516 = vmatprep.subr.bf16.mxu1 %v1063_v0 }
  0x9d   : > { %v308_v29 = vpop.permute.xlu1 %307 }
  0x9e   : > { %v313_v30 = vsel %vm311_vm4, %v306_v28, %v308_v29 }
  0x9f   : > { %443 = vmatprep.subr.bf16.mxu0 %v313_v30 }
  0xa0   : > { %v304_v31 = vpop.permute.xlu0 %303 }
  0xa1   : > { %v310_v32 = vpop.permute.xlu1 %309  ;;  %v312_v33 = vsel %vm311_vm4, %v304_v31, %v306_v28 }
  0xa2   : > { %444 = vmatpush1.bf16.msra.mxu0 %v312_v33  ;;  %v314_v34 = vsel %vm311_vm4, %v308_v29, %v310_v32 }
  0xa3   : > { %517 = vmatpush1.bf16.msra.mxu1 %v314_v34 }
  0xa4   : > { %v321_v35 = vpop.permute.xlu0 %320  ;;  %518 = vmatprep.subr.bf16.mxu1 %v1063_v0 }
  0xa5   : > { %v323_v36 = vpop.permute.xlu1 %322 }
  0xa6   : > { %v328_v37 = vsel %vm326_vm5, %v321_v35, %v323_v36 }
  0xa7   : > { %445 = vmatprep.subr.bf16.mxu0 %v328_v37 }
  0xa8   : > { %v319_v38 = vpop.permute.xlu0 %318 }
  0xa9   : > { %v325_v39 = vpop.permute.xlu1 %324  ;;  %v327_v40 = vsel %vm326_vm5, %v319_v38, %v321_v35 }
  0xaa   : > { %446 = vmatpush1.bf16.msra.mxu0 %v327_v40  ;;  %v329_v41 = vsel %vm326_vm5, %v323_v36, %v325_v39 }
  0xab   : > { %519 = vmatpush1.bf16.msra.mxu1 %v329_v41 }
  0xac   : > { %v336_v42 = vpop.permute.xlu0 %335  ;;  %520 = vmatprep.subr.bf16.mxu1 %v1063_v0 }
  0xad   : > { %v338_v43 = vpop.permute.xlu1 %337 }
  0xae   : > { %v343_v44 = vsel %vm341_vm6, %v336_v42, %v338_v43 }
  0xaf   : > { %447 = vmatprep.subr.bf16.mxu0 %v343_v44 }
  0xb0   : > { %v334_v45 = vpop.permute.xlu0 %333 }
  0xb1   : > { %v340_v46 = vpop.permute.xlu1 %339  ;;  %v342_v47 = vsel %vm341_vm6, %v334_v45, %v336_v42 }
  0xb2   : > { %448 = vmatpush1.bf16.msra.mxu0 %v342_v47  ;;  %v344_v48 = vsel %vm341_vm6, %v338_v43, %v340_v46 }
  0xb3   : > { %521 = vmatpush1.bf16.msra.mxu1 %v344_v48 }
  0xb4   : > { %v351_v49 = vpop.permute.xlu0 %350  ;;  %522 = vmatprep.subr.bf16.mxu1 %v1063_v0 }
  0xb5   : > { %v353_v50 = vpop.permute.xlu1 %352 }
  0xb6   : > { %v358_v51 = vsel %vm356_vm7, %v351_v49, %v353_v50 }
  0xb7   : > { %449 = vmatprep.subr.bf16.mxu0 %v358_v51 }
  0xb8   : > { %v349_v52 = vpop.permute.xlu0 %348 }
  0xb9   : > { %v355_v53 = vpop.permute.xlu1 %354  ;;  %v357_v54 = vsel %vm356_vm7, %v349_v52, %v351_v49 }
  0xba   : > { %450 = vmatpush1.bf16.msra.mxu0 %v357_v54  ;;  %v359_v55 = vsel %vm356_vm7, %v353_v50, %v355_v53 }
  0xbb   : > { %523 = vmatpush1.bf16.msra.mxu1 %v359_v55 }
  0xbc   : > { %v366_v56 = vpop.permute.xlu0 %365  ;;  %524 = vmatprep.subr.bf16.mxu1 %v1063_v0  ;;  %v1028_v0 = vld [vmem:[%s1366_s1 + $0x10] ss:$8 sps:$4 sm:$0xff]  }
  0xbd   : > { %v368_v57 = vpop.permute.xlu1 %367 }
  0xbe   : > { %v373_v58 = vsel %vm371_vm8, %v366_v56, %v368_v57 }
  0xbf   : > { %451 = vmatprep.subr.bf16.mxu0 %v373_v58 }
  0xc0   : > { %v364_v59 = vpop.permute.xlu0 %363 }
  0xc1   : > { %v370_v60 = vpop.permute.xlu1 %369  ;;  %v372_v61 = vsel %vm371_vm8, %v364_v59, %v366_v56 }
  0xc2   : > { %452 = vmatpush1.bf16.msra.mxu0 %v372_v61  ;;  %v374_v63 = vsel %vm371_vm8, %v368_v57, %v370_v60 }
  0xc3   : > { %525 = vmatpush1.bf16.msra.mxu1 %v374_v63 }
  0xc5   : > { %468 = vmatmul.mubr.bf16.vlgmr.msra.gmra.mrb[0].mxu0 %v1023_v62 }
  0xc6   : > { %541 = vmatmul.mubr.bf16.vlgmr.msra.gmra.mrb[0].mxu1 %v1023_v62  ;;  %970 = vmatprep.mubr.msk.bf16.mxu0 %vm422_vm0, %v1026_v1 }
  0xc7   : > { %974 = vmatprep.mubr.msk.bf16.mxu1 %vm422_vm0, %v1026_v1 }
  0xcd   : > { %478 = vmatmul.mubr.bf16.gmra.mrb[4].mxu0 %v1028_v0 }
  0xce   : > { %549 = vmatmul.mubr.bf16.gmra.mrb[4].mxu1 %v1028_v0  ;;  %971 = vmatprep.mubr.msk.bf16.mxu0 %vm422_vm0, %v1029_v2 }
  0xcf   : > { %975 = vmatprep.mubr.msk.bf16.mxu1 %vm422_vm0, %v1029_v2 }
  0xd5   : > { %488 = vmatmul.mubr.bf16.gmra.mrb[8].mxu0 %v1031_v3 }
  0xd6   : > { %557 = vmatmul.mubr.bf16.gmra.mrb[8].mxu1 %v1031_v3  ;;  %972 = vmatprep.mubr.msk.bf16.mxu0 %vm422_vm0, %v1032_v4 }
  0xd7   : > { %976 = vmatprep.mubr.msk.bf16.mxu1 %vm422_vm0, %v1032_v4 }
  0xdd   : > { %498 = vmatmul.mubr.bf16.gmra.mrb[12].mxu0 %v1034_v5 }
  0xde   : > { %565 = vmatmul.mubr.bf16.gmra.mrb[12].mxu1 %v1034_v5 }
 0x198   : > { %v1168_v15 = vpop.f32.mrb[0].mxu0 }
 0x199   : > { %v589_v16 = vmul.f32 %v1162_v12, %v1168_v15  ;;  %v1172_v17 = vpop.f32.mrb[0].mxu1  ;;  %v1174_v18 = vpop.f32.mrb[1].mxu0 }
 0x19a   : > { %v590_v19 = vmul.f32 %v1164_v13, %v1174_v18  ;;  %v544_v20 = vpop.f32.mrb[1].mxu1  ;;  %v1178_v21 = vpop.f32.mrb[2].mxu0  ;;  %v591_v26 = vmul.f32 %v1166_v14, %v1172_v17 }
 0x19b   : > { %v645_v22 = vmul.f32 %v589_v16, %v1168_v15  ;;  %v592_v23 = vmul.f32 %v1162_v12, %v1178_v21  ;;  %v1183_v24 = vpop.f32.mrb[2].mxu1  ;;  %v1185_v25 = vpop.f32.mrb[3].mxu0 }
 0x19c   : > { %v646_v27 = vmul.f32 %v590_v19, %v1174_v18  ;;  %v593_v28 = vmul.f32 %v1164_v13, %v1185_v25  ;;  %v547_v29 = vpop.f32.mrb[3].mxu1  ;;  %v613_v30 = vadd.f32 %v590_v19, %v589_v16  ;;  %v594_v31 = vmul.f32 %v1166_v14, %v1183_v24 }
 0x19d   : > { %v648_v32 = vmul.f32 %v592_v23, %v1178_v21  ;;  %v647_v36 = vmul.f32 %v591_v26, %v1172_v17 }
 0x19e   : > { %v649_v33 = vmul.f32 %v593_v28, %v1185_v25  ;;  %v614_v34 = vadd.f32 %v613_v30, %v591_v26  ;;  %v617_v35 = vadd.f32 %v593_v28, %v592_v23  ;;  %v669_v37 = vadd.f32 %v646_v27, %v645_v22 }
 0x19f   : > { %v650_v40 = vmul.f32 %v594_v31, %v1183_v24 }
 0x1a0   : > { %615 = vadd.xlane.f32.xlu0 %v614_v34  ;;  %v1197_v38 = vpop.f32.mrb[4].mxu0  ;;  %v618_v39 = vadd.f32 %v617_v35, %v594_v31  ;;  %v673_v41 = vadd.f32 %v649_v33, %v648_v32  ;;  %v670_v45 = vadd.f32 %v669_v37, %v647_v36 }
 0x1a1   : > { %v1200_v42 = vpop.f32.mrb[4].mxu1  ;;  %v595_v43 = vmul.f32 %v1162_v12, %v1197_v38  ;;  %v1204_v44 = vpop.f32.mrb[5].mxu0 }
 0x1a2   : > { %v596_v46 = vmul.f32 %v1164_v13, %v1204_v44  ;;  %v552_v47 = vpop.f32.mrb[5].mxu1  ;;  %619 = vadd.xlane.f32.xlu1 %v618_v39  ;;  %v1208_v48 = vpop.f32.mrb[6].mxu0  ;;  %v674_v49 = vadd.f32 %v673_v41, %v650_v40  ;;  %v597_v50 = vmul.f32 %v1166_v14, %v1200_v42 }
 0x1a3   : > { %v651_v51 = vmul.f32 %v595_v43, %v1197_v38  ;;  %v1213_v52 = vpop.f32.mrb[6].mxu1  ;;  %v598_v53 = vmul.f32 %v1162_v12, %v1208_v48  ;;  %v1217_v54 = vpop.f32.mrb[7].mxu0 }
 0x1a4   : > { %v652_v55 = vmul.f32 %v596_v46, %v1204_v44  ;;  %v599_v56 = vmul.f32 %v1164_v13, %v1217_v54  ;;  %v555_v57 = vpop.f32.mrb[7].mxu1  ;;  %675 = vadd.xlane.f32.xlu0 %v674_v49  ;;  %v621_v58 = vadd.f32 %v596_v46, %v595_v43  ;;  %v653_v60 = vmul.f32 %v597_v50, %v1200_v42 }
 0x1a5   : > { %v654_v59 = vmul.f32 %v598_v53, %v1208_v48  ;;  %v600_v61 = vmul.f32 %v1166_v14, %v1213_v52 }
 0x1a6   : > { %v655_v62 = vmul.f32 %v599_v56, %v1217_v54  ;;  %671 = vadd.xlane.f32.xlu1 %v670_v45  ;;  %v622_v63 = vadd.f32 %v621_v58, %v597_v50  ;;  %v677_v1 = vadd.f32 %v652_v55, %v651_v51  ;;  %v625_v0 = vadd.f32 %v599_v56, %v598_v53 }
 0x1a7   : > { %v656_v5 = vmul.f32 %v600_v61, %v1213_v52 }
 0x1a8   : > { %623 = vadd.xlane.f32.xlu0 %v622_v63  ;;  %v1227_v2 = vpop.f32.mrb[8].mxu0  ;;  %v678_v3 = vadd.f32 %v677_v1, %v653_v60  ;;  %v626_v4 = vadd.f32 %v625_v0, %v600_v61  ;;  %v681_v6 = vadd.f32 %v655_v62, %v654_v59 }
 0x1a9   : > { %v1230_v7 = vpop.f32.mrb[8].mxu1  ;;  %v601_v8 = vmul.f32 %v1162_v12, %v1227_v2  ;;  %v1234_v9 = vpop.f32.mrb[9].mxu0 }
 0x1aa   : > { %v602_v10 = vmul.f32 %v1164_v13, %v1234_v9  ;;  %v560_v11 = vpop.f32.mrb[9].mxu1  ;;  %679 = vadd.xlane.f32.xlu1 %v678_v3  ;;  %v1238_v16 = vpop.f32.mrb[10].mxu0  ;;  %v682_v19 = vadd.f32 %v681_v6, %v656_v5  ;;  %v603_v20 = vmul.f32 %v1166_v14, %v1230_v7 }
 0x1ab   : > { %v657_v22 = vmul.f32 %v601_v8, %v1227_v2  ;;  %v1243_v23 = vpop.f32.mrb[10].mxu1  ;;  %v604_v26 = vmul.f32 %v1162_v12, %v1238_v16  ;;  %v1247_v27 = vpop.f32.mrb[11].mxu0 }
 0x1ac   : > { %v658_v28 = vmul.f32 %v602_v10, %v1234_v9  ;;  %v605_v29 = vmul.f32 %v1164_v13, %v1247_v27  ;;  %v563_v30 = vpop.f32.mrb[11].mxu1  ;;  %627 = vadd.xlane.f32.xlu0 %v626_v4  ;;  %v629_v31 = vadd.f32 %v602_v10, %v601_v8  ;;  %v659_v33 = vmul.f32 %v603_v20, %v1230_v7 }
 0x1ad   : > { %v660_v32 = vmul.f32 %v604_v26, %v1238_v16  ;;  %v606_v34 = vmul.f32 %v1166_v14, %v1243_v23 }
 0x1ae   : > { %v661_v35 = vmul.f32 %v605_v29, %v1247_v27  ;;  %v630_v36 = vadd.f32 %v629_v31, %v603_v20  ;;  %v685_v37 = vadd.f32 %v658_v28, %v657_v22  ;;  %v633_v39 = vadd.f32 %v605_v29, %v604_v26 }
 0x1af   : > { %v662_v40 = vmul.f32 %v606_v34, %v1243_v23 }
 0x1b0   : > { %683 = vadd.xlane.f32.xlu0 %v682_v19  ;;  %631 = vadd.xlane.f32.xlu1 %v630_v36  ;;  %v1258_v41 = vpop.f32.mrb[12].mxu0  ;;  %v686_v43 = vadd.f32 %v685_v37, %v659_v33  ;;  %v634_v45 = vadd.f32 %v633_v39, %v606_v34  ;;  %v689_v46 = vadd.f32 %v661_v35, %v660_v32 }
 0x1b1   : > { %v1260_v47 = vpop.f32.mrb[12].mxu1  ;;  %v607_v49 = vmul.f32 %v1162_v12, %v1258_v41  ;;  %v1264_v50 = vpop.f32.mrb[13].mxu0 }
 0x1b2   : > { %v608_v51 = vmul.f32 %v1164_v13, %v1264_v50  ;;  %v568_v53 = vpop.f32.mrb[13].mxu1  ;;  %v1268_v55 = vpop.f32.mrb[14].mxu0  ;;  %v690_v56 = vadd.f32 %v689_v46, %v662_v40  ;;  %v609_v57 = vmul.f32 %v1166_v14, %v1260_v47 }
 0x1b3   : > { %v663_v58 = vmul.f32 %v607_v49, %v1258_v41  ;;  %v610_v59 = vmul.f32 %v1162_v12, %v1268_v55  ;;  %v1275_v60 = vpop.f32.mrb[14].mxu1  ;;  %v1277_v61 = vpop.f32.mrb[15].mxu0 }
 0x1b4   : > { %v664_v62 = vmul.f32 %v608_v51, %v1264_v50  ;;  %v611_v63 = vmul.f32 %v1164_v13, %v1277_v61  ;;  %v571_v1 = vpop.f32.mrb[15].mxu1  ;;  %687 = vadd.xlane.f32.xlu1 %v686_v43  ;;  %635 = vadd.xlane.f32.xlu0 %v634_v45  ;;  %v637_v0 = vadd.f32 %v608_v51, %v607_v49 }
 0x1b5   : > { %v666_v3 = vmul.f32 %v610_v59, %v1268_v55  ;;  %v665_v4 = vmul.f32 %v609_v57, %v1260_v47  ;;  %v612_v12 = vmul.f32 %v1166_v14, %v1275_v60 }
 0x1b6   : > { %v667_v5 = vmul.f32 %v611_v63, %v1277_v61  ;;  %v638_v6 = vadd.f32 %v637_v0, %v609_v57  ;;  %v693_v8 = vadd.f32 %v664_v62, %v663_v58  ;;  %v641_v10 = vadd.f32 %v611_v63, %v610_v59 }
 0x1b7   : > { %v668_v11 = vmul.f32 %v612_v12, %v1275_v60 }
 0x1b8   : > { %691 = vadd.xlane.f32.xlu0 %v690_v56  ;;  %639 = vadd.xlane.f32.xlu1 %v638_v6  ;;  %v694_v13 = vadd.f32 %v693_v8, %v665_v4  ;;  %v642_v19 = vadd.f32 %v641_v10, %v612_v12  ;;  %v697_v20 = vadd.f32 %v667_v5, %v666_v3 }
 0x1ba   : > { %v698_v22 = vadd.f32 %v697_v20, %v668_v11 }
 0x1bc   : > { %695 = vadd.xlane.f32.xlu1 %v694_v13  ;;  %643 = vadd.xlane.f32.xlu0 %v642_v19 }
 0x1c0   : > { %699 = vadd.xlane.f32.xlu0 %v698_v22 }
 0x22d   : > { %v616_v26 = vpop.xlane.xlu0 %615 }
 0x22f   : > { %v620_v28 = vpop.xlane.xlu1 %619 }
 0x231   : > { %v676_v29 = vpop.xlane.xlu0 %675 }
 0x233   : > { %v672_v14 = vpop.xlane.xlu1 %671 }
 0x235   : > { %v624_v30 = vpop.xlane.xlu0 %623 }
 0x236   : > { %v701_v37 = vadd.f32 %v624_v30, %v616_v26 }
 0x237   : > { %v680_v31 = vpop.xlane.xlu1 %679 }
 0x238   : > { %v707_v45 = vadd.f32 %v680_v31, %v672_v14 }
 0x239   : > { %v628_v32 = vpop.xlane.xlu0 %627 }
 0x23a   : > { %v702_v46 = vadd.f32 %v628_v32, %v620_v28 }
 0x23d   : > { %v684_v33 = vpop.xlane.xlu0 %683  ;;  %v632_v34 = vpop.xlane.xlu1 %631 }
 0x23e   : > { %v703_v39 = vadd.f32 %v701_v37, %v632_v34  ;;  %v708_v59 = vadd.f32 %v684_v33, %v676_v29 }
 0x241   : > { %v688_v35 = vpop.xlane.xlu1 %687  ;;  %v636_v36 = vpop.xlane.xlu0 %635 }
 0x242   : > { %v709_v51 = vadd.f32 %v707_v45, %v688_v35  ;;  %v704_v53 = vadd.f32 %v702_v46, %v636_v36 }
 0x245   : > { %v692_v40 = vpop.xlane.xlu0 %691  ;;  %v640_v43 = vpop.xlane.xlu1 %639 }
 0x246   : > { %v705_v49 = vadd.f32 %v703_v39, %v640_v43  ;;  %v710_v1 = vadd.f32 %v708_v59, %v692_v40 }
 0x248   : > { %v713_v56 = vmul.f32 0.0009765625, %v705_v49 }
 0x249   : > { %v696_v57 = vpop.xlane.xlu1 %695  ;;  %v644_v58 = vpop.xlane.xlu0 %643 }
 0x24a   : > { %v711_v62 = vadd.f32 %v709_v51, %v696_v57  ;;  %v706_v63 = vadd.f32 %v704_v53, %v644_v58  ;;  %729 = vperm.xlu1 %1014, %v713_v56   ;;  %v717_v0 = vmul.f32 %v713_v56, %v713_v56 }
 0x24c   : > { %v715_v3 = vmul.f32 0.0009765625, %v711_v62  ;;  %v714_v4 = vmul.f32 0.0009765625, %v706_v63 }
 0x24d   : > { %v700_v12 = vpop.xlane.xlu0 %699 }
 0x24e   : > { %v719_v5 = vsub.f32 %v715_v3, %v717_v0  ;;  %v712_v6 = vadd.f32 %v710_v1, %v700_v12  ;;  %734 = vperm.xlu0 %1015, %v714_v4   ;;  %v718_v10 = vmul.f32 %v714_v4, %v714_v4 }
 0x250   : > { %v721_v8 = vmax.f32 %v719_v5, 0.0  ;;  %v716_v11 = vmul.f32 0.0009765625, %v712_v6 }
 0x252   : > { %v723_v13 = vadd.f32 1e-05, %v721_v8  ;;  %v720_v19 = vsub.f32 %v716_v11, %v718_v10 }
 0x254   : > { %1035 = vrsqrt.f32 %v723_v13  ;;  %v722_v20 = vmax.f32 %v720_v19, 0.0 }
 0x256   : > { %v724_v22 = vadd.f32 1e-05, %v722_v20 }
 0x258   : > { %1037 = vrsqrt.f32 %v724_v22 }
 0x25e   : > { %v1036_v26 = vpop.eup %1035 }
 0x25f   : > { %763 = vperm.xlu1 %1014, %v1036_v26  }
 0x262   : > { %v1038_v28 = vpop.eup %1037 }
 0x263   : > { %768 = vperm.xlu1 %1014, %v1038_v28  }
 0x2c9   : > { %v730_v29 = vpop.permute.xlu1 %729 }
 0x2ca   : > { %v737_v14 = vsub.f32 %v1168_v15, %v730_v29  ;;  %v738_v30 = vsub.f32 %v1174_v18, %v730_v29  ;;  %v739_v31 = vsub.f32 %v1172_v17, %v730_v29  ;;  %v743_v32 = vsub.f32 %v1197_v38, %v730_v29 }
 0x2cb   : > { %v744_v34 = vsub.f32 %v1204_v44, %v730_v29  ;;  %v745_v35 = vsub.f32 %v1200_v42, %v730_v29  ;;  %v749_v36 = vsub.f32 %v1227_v2, %v730_v29  ;;  %v750_v37 = vsub.f32 %v1234_v9, %v730_v29 }
 0x2cc   : > { %v751_v39 = vsub.f32 %v1230_v7, %v730_v29  ;;  %v755_v15 = vsub.f32 %v1258_v41, %v730_v29  ;;  %v756_v18 = vsub.f32 %v1264_v50, %v730_v29  ;;  %v757_v17 = vsub.f32 %v1260_v47, %v730_v29 }
 0x2cd   : > { %v1292_v33 = vpop.permute.xlu0 %734 }
 0x2ce   : > { %v740_v38 = vsub.f32 %v1178_v21, %v1292_v33  ;;  %v741_v44 = vsub.f32 %v1185_v25, %v1292_v33  ;;  %v742_v42 = vsub.f32 %v1183_v24, %v1292_v33  ;;  %v746_v2 = vsub.f32 %v1208_v48, %v1292_v33 }
 0x2cf   : > { %v747_v7 = vsub.f32 %v1217_v54, %v1292_v33  ;;  %v748_v9 = vsub.f32 %v1213_v52, %v1292_v33  ;;  %v752_v41 = vsub.f32 %v1238_v16, %v1292_v33  ;;  %v753_v21 = vsub.f32 %v1247_v27, %v1292_v33 }
 0x2d0   : > { %v754_v25 = vsub.f32 %v1243_v23, %v1292_v33  ;;  %v758_v24 = vsub.f32 %v1268_v55, %v1292_v33  ;;  %v759_v48 = vsub.f32 %v1277_v61, %v1292_v33  ;;  %v760_v54 = vsub.f32 %v1275_v60, %v1292_v33 }
 0x2de   : > { %v764_v47 = vpop.permute.xlu1 %763 }
 0x2df   : > { %v771_v52 = vmul.f32 %v764_v47, %v737_v14  ;;  %v772_v50 = vmul.f32 %v764_v47, %v738_v30  ;;  %v773_v40 = vmul.f32 %v764_v47, %v739_v31  ;;  %v777_v16 = vmul.f32 %v764_v47, %v743_v32 }
 0x2e0   : > { %v778_v43 = vmul.f32 %v764_v47, %v744_v34  ;;  %v779_v45 = vmul.f32 %v764_v47, %v745_v35  ;;  %v783_v27 = vmul.f32 %v764_v47, %v749_v36  ;;  %v784_v46 = vmul.f32 %v764_v47, %v750_v37 }
 0x2e1   : > { %v785_v23 = vmul.f32 %v764_v47, %v751_v39  ;;  %v789_v55 = vmul.f32 %v764_v47, %v755_v15  ;;  %v790_v61 = vmul.f32 %v764_v47, %v756_v18  ;;  %v791_v60 = vmul.f32 %v764_v47, %v757_v17 }
 0x2e2   : > { %v795_v49 = vmax.f32 %v771_v52, 0.0  ;;  %v796_v51 = vmax.f32 %v772_v50, 0.0  ;;  %v797_v53 = vmax.f32 %v773_v40, 0.0  ;;  %v801_v56 = vmax.f32 %v777_v16, 0.0  ;;  %v769_v57 = vpop.permute.xlu1 %768 }
 0x2e3   : > { %v802_v58 = vmax.f32 %v778_v43, 0.0  ;;  %v803_v59 = vmax.f32 %v779_v45, 0.0  ;;  %v807_v62 = vmax.f32 %v783_v27, 0.0  ;;  %v808_v63 = vmax.f32 %v784_v46, 0.0 }
 0x2e4   : > { %v809_v1 = vmax.f32 %v785_v23, 0.0  ;;  %v813_v0 = vmax.f32 %v789_v55, 0.0  ;;  %v814_v3 = vmax.f32 %v790_v61, 0.0  ;;  %v815_v4 = vmax.f32 %v791_v60, 0.0  ;;  %819 = vst [vmem:[%s1330_s25] sm:$0xff] %v795_v49  ;;  %820 = vst [vmem:[%s1330_s25 + $0x8] sm:$0xff] %v796_v51 }
 0x2e5   : > { %821 = vst [vmem:[%s1330_s25 + $0x10] sm:$0xff] %v797_v53  ;;  %825 = vst [vmem:[%s1330_s25 + $0x30] sm:$0xff] %v801_v56  ;;  %v774_v12 = vmul.f32 %v769_v57, %v740_v38  ;;  %v775_v5 = vmul.f32 %v769_v57, %v741_v44  ;;  %v776_v6 = vmul.f32 %v769_v57, %v742_v42 }
 0x2e6   : > { %826 = vst [vmem:[%s1330_s25 + $0x38] sm:$0xff] %v802_v58  ;;  %827 = vst [vmem:[%s1330_s25 + $0x40] sm:$0xff] %v803_v59  ;;  %v780_v8 = vmul.f32 %v769_v57, %v746_v2  ;;  %v781_v10 = vmul.f32 %v769_v57, %v747_v7  ;;  %v782_v11 = vmul.f32 %v769_v57, %v748_v9 }
 0x2e7   : > { %831 = vst [vmem:[%s1330_s25 + $0x60] sm:$0xff] %v807_v62  ;;  %832 = vst [vmem:[%s1330_s25 + $0x68] sm:$0xff] %v808_v63  ;;  %v786_v13 = vmul.f32 %v769_v57, %v752_v41  ;;  %v787_v19 = vmul.f32 %v769_v57, %v753_v21  ;;  %v788_v20 = vmul.f32 %v769_v57, %v754_v25  ;;  %v798_v29 = vmax.f32 %v774_v12, 0.0 }
 0x2e8   : > { %833 = vst [vmem:[%s1330_s25 + $0x70] sm:$0xff] %v809_v1  ;;  %837 = vst [vmem:[%s1330_s25 + $0x90] sm:$0xff] %v813_v0  ;;  %v792_v22 = vmul.f32 %v769_v57, %v758_v24  ;;  %v793_v26 = vmul.f32 %v769_v57, %v759_v48  ;;  %v794_v28 = vmul.f32 %v769_v57, %v760_v54  ;;  %v799_v14 = vmax.f32 %v775_v5, 0.0 }
 0x2e9   : > { %838 = vst [vmem:[%s1330_s25 + $0x98] sm:$0xff] %v814_v3  ;;  %839 = vst [vmem:[%s1330_s25 + $0xa0] sm:$0xff] %v815_v4  ;;  %v800_v30 = vmax.f32 %v776_v6, 0.0  ;;  %v804_v31 = vmax.f32 %v780_v8, 0.0  ;;  %v805_v32 = vmax.f32 %v781_v10, 0.0  ;;  %v806_v33 = vmax.f32 %v782_v11, 0.0 }
 0x2ea   : > { %v810_v34 = vmax.f32 %v786_v13, 0.0  ;;  %v811_v35 = vmax.f32 %v787_v19, 0.0  ;;  %v812_v36 = vmax.f32 %v788_v20, 0.0  ;;  %v816_v37 = vmax.f32 %v792_v22, 0.0  ;;  %822 = vst [vmem:[%s1330_s25 + $0x18] sm:$0xff] %v798_v29  ;;  %823 = vst [vmem:[%s1330_s25 + $0x20] sm:$0xff] %v799_v14 }
 0x2eb   : > { %v817_v39 = vmax.f32 %v793_v26, 0.0  ;;  %v818_v15 = vmax.f32 %v794_v28, 0.0  ;;  %824 = vst [vmem:[%s1330_s25 + $0x28] sm:$0xff] %v800_v30  ;;  %828 = vst [vmem:[%s1330_s25 + $0x48] sm:$0xff] %v804_v31 }
 0x2ec   : > { %829 = vst [vmem:[%s1330_s25 + $0x50] sm:$0xff] %v805_v32  ;;  %830 = vst [vmem:[%s1330_s25 + $0x58] sm:$0xff] %v806_v33 }
 0x2ed   : > { %834 = vst [vmem:[%s1330_s25 + $0x78] sm:$0xff] %v810_v34  ;;  %835 = vst [vmem:[%s1330_s25 + $0x80] sm:$0xff] %v811_v35 }
 0x2ee   : > { %836 = vst [vmem:[%s1330_s25 + $0x88] sm:$0xff] %v812_v36  ;;  %840 = vst [vmem:[%s1330_s25 + $0xa8] sm:$0xff] %v816_v37 }
 0x2ef   : > { %841 = vst [vmem:[%s1330_s25 + $0xb0] sm:$0xff] %v817_v39  ;;  %842 = vst [vmem:[%s1330_s25 + $0xb8] sm:$0xff] %v818_v15 }
 0x2f0 PF: > { %s13_s14 = sadd.s32 1, %s1061_s14   ;;  %s1369_s12 = smov %s1057_s13 }
 0x2f1   : > { %p10_p5 = scmp.ge.s32.totalorder %s13_s14, 4   ;;  %s1370_s13 = smov %s1372_s15 }
 0x2f3   :  { %12 = sbr.rel (!%p10_p5) target bundleno = 2 (0x2), region = 65 }

</bundles_post_ra>
